<compile_context>
chip_gen: v5e
topology: v5e:2x2
jax: 0.10.0
libtpu: 0.0.40
codegen_flags: <defaults>
</compile_context>

<pallas_src>
import functools
import math

import jax
import jax.numpy as jnp
from jax.experimental import pallas as pl
from jax.experimental.pallas import tpu as pltpu


def _round_up(x, m):
    return (x + m - 1) // m * m


def _pick_vmem_limit_bytes():
    # Re-derive the VMEM budget per generation (64 MiB on v7x, 128 MiB on v5e/v6e).
    try:
        cap = int(pltpu.get_tpu_info().vmem_capacity_bytes)
    except Exception:
        cap = 64 << 20
    return int(min(cap * 3 // 4, 96 << 20))


def _timestep_embedder_kernel(t_ref, freqs_ref, w12_ref, b12_ref, o_ref, *, tile_n):
    # Timesteps are VMEM-resident; slice this grid step's rows (tile_n is a
    # multiple of 8, so the sublane slice is aligned).
    i = pl.program_id(0)
    start = pl.multiple_of(i * tile_n, tile_n)
    t = t_ref[pl.ds(start, tile_n), :]                 # (tn, 1) f32

    # Sinusoidal embedding: args = t * freqs ; emb = [cos(args) | sin(args)].
    args = t * freqs_ref[...]                          # (tn, half) f32
    emb = jnp.concatenate([jnp.cos(args), jnp.sin(args)], axis=-1)   # (tn, D) f32

    # Fused MLP (LeakyReLU(True) -> slope 1.0 -> identity): one K=D f32 GEMM.
    out = jnp.dot(emb, w12_ref[...], preferred_element_type=jnp.float32) + b12_ref[...]
    o_ref[...] = out.astype(o_ref.dtype)


def pack_params(params, frequency_embedding_size, hidden_size, num_diffusionsteps):
    """One-time parameter packing (do NOT call per forward pass).

    Collapses the identity-activation MLP:
        (emb @ w1 + b1) @ w2 + b2  ==  emb @ (w1 @ w2) + (b1 @ w2 + b2)
    and pads the hidden dim to a multiple of 128 for lane-dense stores.
    """
    w1, b1, w2, b2 = params                    # stored (in, out)
    D = frequency_embedding_size
    H = hidden_size
    assert D % 2 == 0, "even frequency_embedding_size assumed"
    # TODO(synk): odd-`dim` zero-padding branch of timestep_embedding not implemented.
    half = D // 2
    H_pad = _round_up(H, 128)

    w1f = w1.astype(jnp.float32)
    w2f = w2.astype(jnp.float32)
    w12 = w1f @ w2f                                            # (D, H) f32
    b12 = b1.astype(jnp.float32) @ w2f + b2.astype(jnp.float32)  # (H,)  f32

    w12p = jnp.zeros((D, H_pad), jnp.float32).at[:, :H].set(w12)
    b12p = jnp.zeros((1, H_pad), jnp.float32).at[0, :H].set(b12)

    freqs = jnp.exp(
        -math.log(num_diffusionsteps) * jnp.arange(half, dtype=jnp.float32) / half
    ).reshape(1, half)

    return w12p, b12p, freqs, H


def timestep_embedder(t, packed, *, max_tile_n=256):
    """t: (N,) float/int timesteps. Returns (N, hidden_size) float32."""
    w12p, b12p, freqs, H = packed
    D, H_pad = w12p.shape
    half = freqs.shape[1]
    N = t.shape[0]

    # Pick the batch tile (multiple of 8, <= max_tile_n) minimizing padding waste;
    # among equal waste prefer the largest tile.
    tn = min(range(8, max_tile_n + 1, 8), key=lambda c: (_round_up(N, c) - N, -c))
    n_pad = _round_up(N, tn)
    n_tiles = n_pad // tn

    t2d = jnp.zeros((n_pad, 1), jnp.float32).at[:N, 0].set(t.astype(jnp.float32))

    kernel = functools.partial(_timestep_embedder_kernel, tile_n=tn)

    cost = pl.CostEstimate(
        flops=2 * n_pad * D * H_pad,
        transcendentals=n_pad * D,                     # cos + sin over (n_pad, half)
        bytes_accessed=4 * (n_pad * 1 + half + D * H_pad + H_pad + n_pad * H_pad),
    )

    # Grid sharding across cores only pays off when there are several tiles;
    # otherwise each core would re-DMA the resident weights for little work.
    semantics = ("parallel",) if n_tiles >= 4 else ("arbitrary",)

    resident = functools.partial(pl.BlockSpec, pipeline_mode=pl.Buffered(buffer_count=1))

    out = pl.pallas_call(
        kernel,
        out_shape=jax.ShapeDtypeStruct((n_pad, H_pad), jnp.float32),
        grid=(n_tiles,),
        in_specs=[
            resident((n_pad, 1), lambda i: (0, 0)),    # timesteps: resident, sliced in-kernel
            resident((1, half), lambda i: (0, 0)),     # freqs: resident
            resident((D, H_pad), lambda i: (0, 0)),    # fused W12: resident
            resident((1, H_pad), lambda i: (0, 0)),    # fused b12: resident
        ],
        out_specs=pl.BlockSpec((tn, H_pad), lambda i: (i, 0)),
        compiler_params=pltpu.CompilerParams(
            dimension_semantics=semantics,
            vmem_limit_bytes=_pick_vmem_limit_bytes(),
        ),
        cost_estimate=cost,
    )(t2d, freqs, w12p, b12p)

    return out[:N, :H]


def init_params(key, frequency_embedding_size, hidden_size):
    """Deterministic init mimicking nn.Linear default (uniform(-1/sqrt(fan_in), +))."""
    k1, k2, k3, k4 = jax.random.split(key, 4)
    bound1 = 1.0 / math.sqrt(frequency_embedding_size)
    bound2 = 1.0 / math.sqrt(hidden_size)
    # Stored as (in, out) — transposed relative to PyTorch's (out, in).
    w1 = jax.random.uniform(k1, (frequency_embedding_size, hidden_size),
                            jnp.float32, -bound1, bound1)
    b1 = jax.random.uniform(k2, (hidden_size,), jnp.float32, -bound1, bound1)
    w2 = jax.random.uniform(k3, (hidden_size, hidden_size),
                            jnp.float32, -bound2, bound2)
    b2 = jax.random.uniform(k4, (hidden_size,), jnp.float32, -bound2, bound2)
    return w1, b1, w2, b2


def _reference(t, params, frequency_embedding_size, num_diffusionsteps):
    """Pure-JAX f32 reference matching the PyTorch module (as written)."""
    w1, b1, w2, b2 = params
    half = frequency_embedding_size // 2
    freqs = jnp.exp(
        -math.log(num_diffusionsteps) * jnp.arange(half, dtype=jnp.float32) / half
    )
    args = t.astype(jnp.float32)[:, None] * freqs[None, :]
    emb = jnp.concatenate([jnp.cos(args), jnp.sin(args)], axis=-1)
    h = emb @ w1 + b1
    h = jnp.where(h >= 0.0, h, 1.0 * h)   # nn.LeakyReLU(True) -> slope 1.0 (identity)
    return h @ w2 + b2


if __name__ == "__main__":
    N = 16                               # batch of timesteps
    frequency_embedding_size = 256       # D (even)
    hidden_size = 128                    # H (lane-dense)
    num_diffusionsteps = 1000

    key = jax.random.PRNGKey(0)
    kp, kt = jax.random.split(key)
    params = init_params(kp, frequency_embedding_size, hidden_size)
    # Fractional timesteps in [0, num_diffusionsteps)
    t = jax.random.uniform(kt, (N,), jnp.float32, 0.0, float(num_diffusionsteps))

    # One-time parameter packing (hoisted out of the per-call path).
    packed = jax.block_until_ready(
        pack_params(params, frequency_embedding_size, hidden_size, num_diffusionsteps)
    )

    out = timestep_embedder(t, packed)
    out = jax.block_until_ready(out)

    ref = _reference(t, params, frequency_embedding_size, num_diffusionsteps)
    assert out.shape == (N, hidden_size)
    max_err = float(jnp.max(jnp.abs(out - ref)))
    # f32 GEMM; only the W1@W2 reassociation differs from the reference.
    assert jnp.allclose(out, ref, atol=2e-3, rtol=2e-3), (
        f"mismatch vs reference (max abs err {max_err:.3e})"
    )
    print("KERNEL_OK")
</pallas_src>

<mosaic_0001>
module attributes {stable_mosaic.version = 11 : i64} {
  func.func @_timestep_embedder_kernel(%arg0: i32, %arg1: memref<16x1xf32, #tpu.memory_space<vmem>>, %arg2: memref<1x128xf32, #tpu.memory_space<vmem>>, %arg3: memref<256x128xf32, #tpu.memory_space<vmem>>, %arg4: memref<1x128xf32, #tpu.memory_space<vmem>>, %arg5: memref<16x128xf32, #tpu.memory_space<vmem>>) attributes {dimension_semantics = [#tpu.dimension_semantics<arbitrary>], iteration_bounds = array<i64: 1>, scalar_prefetch = 0 : i64, scratch_operands = 0 : i64, tpu.core_type = #tpu.core_type<tc>, window_params = [{pipeline_mode = #tpu.pipeline_mode<synchronous>, transform_indices = @transform_0, window_bounds = array<i64: 16, 1>}, {pipeline_mode = #tpu.pipeline_mode<synchronous>, transform_indices = @transform_1, window_bounds = array<i64: 1, 128>}, {pipeline_mode = #tpu.pipeline_mode<synchronous>, transform_indices = @transform_2, window_bounds = array<i64: 256, 128>}, {pipeline_mode = #tpu.pipeline_mode<synchronous>, transform_indices = @transform_3, window_bounds = array<i64: 1, 128>}, {transform_indices = @transform_4, window_bounds = array<i64: 16, 128>}]} {
    %c16_i32 = arith.constant 16 : i32
    %0 = arith.muli %arg0, %c16_i32 : i32
    %1 = tpu.assume_multiple %0, 16 : i32
    %2 = arith.index_cast %1 : i32 to index
    %c0 = arith.constant 0 : index
    %3 = vector.load %arg1[%2, %c0] : memref<16x1xf32, #tpu.memory_space<vmem>>, vector<16x1xf32>
    %c0_0 = arith.constant 0 : index
    %c0_1 = arith.constant 0 : index
    %4 = vector.load %arg2[%c0_0, %c0_1] : memref<1x128xf32, #tpu.memory_space<vmem>>, vector<1x128xf32>
    %5 = vector.broadcast %3 : vector<16x1xf32> to vector<16x128xf32>
    %6 = vector.broadcast %4 : vector<1x128xf32> to vector<16x128xf32>
    %7 = arith.mulf %5, %6 : vector<16x128xf32>
    %8 = math.cos %7 : vector<16x128xf32>
    %9 = math.sin %7 : vector<16x128xf32>
    %10 = tpu.concatenate %8, %9 in 1 : vector<16x128xf32>, vector<16x128xf32> -> vector<16x256xf32>
    %c0_2 = arith.constant 0 : index
    %c0_3 = arith.constant 0 : index
    %11 = vector.load %arg3[%c0_2, %c0_3] : memref<256x128xf32, #tpu.memory_space<vmem>>, vector<256x128xf32>
    %cst = arith.constant dense<0.000000e+00> : vector<16x128xf32>
    %12 = tpu.matmul %10, %11, %cst {dimension_numbers = #tpu.dot_dimension_numbers<[1], [0], [0], [1], [0, 0, 1, 1], [], []>} : vector<16x256xf32>, vector<256x128xf32>, vector<16x128xf32> -> vector<16x128xf32>
    %c0_4 = arith.constant 0 : index
    %c0_5 = arith.constant 0 : index
    %13 = vector.load %arg4[%c0_4, %c0_5] : memref<1x128xf32, #tpu.memory_space<vmem>>, vector<1x128xf32>
    %14 = vector.broadcast %13 : vector<1x128xf32> to vector<16x128xf32>
    %15 = arith.addf %12, %14 : vector<16x128xf32>
    %c0_6 = arith.constant 0 : index
    %c0_7 = arith.constant 0 : index
    %16 = vector.load %arg5[%c0_6, %c0_7] : memref<16x128xf32, #tpu.memory_space<vmem>>, vector<16x128xf32>
    tpu.vector_store %arg5[%c0_6, %c0_7], %15 {strides = array<i32>} : memref<16x128xf32, #tpu.memory_space<vmem>>, vector<16x128xf32>,
    return
  }
  func.func @transform_0(%arg0: i32) -> (i32, i32) {
    %c0_i32 = arith.constant 0 : i32
    %c0_i32_0 = arith.constant 0 : i32
    %c0_i32_1 = arith.constant 0 : i32
    return %c0_i32, %c0_i32_0 : i32, i32
  }
  func.func @transform_1(%arg0: i32) -> (i32, i32) {
    %c0_i32 = arith.constant 0 : i32
    %c0_i32_0 = arith.constant 0 : i32
    %c0_i32_1 = arith.constant 0 : i32
    return %c0_i32, %c0_i32_0 : i32, i32
  }
  func.func @transform_2(%arg0: i32) -> (i32, i32) {
    %c0_i32 = arith.constant 0 : i32
    %c0_i32_0 = arith.constant 0 : i32
    %c0_i32_1 = arith.constant 0 : i32
    return %c0_i32, %c0_i32_0 : i32, i32
  }
  func.func @transform_3(%arg0: i32) -> (i32, i32) {
    %c0_i32 = arith.constant 0 : i32
    %c0_i32_0 = arith.constant 0 : i32
    %c0_i32_1 = arith.constant 0 : i32
    return %c0_i32, %c0_i32_0 : i32, i32
  }
  func.func @transform_4(%arg0: i32) -> (i32, i32) {
    %c0_i32 = arith.constant 0 : i32
    %c0_i32_0 = arith.constant 0 : i32
    return %arg0, %c0_i32 : i32, i32
  }
}

</mosaic_0001>

<bundles_post_ra>
// kernel: tpu_custom_call.1
= control target key start
LH: loop header
LB: loop body
LE: loop exit
PB: predicated region body
PF: predicated region fallthrough
CT: control target
= control target key end

     0   :  { %9 = vsyncpa [#allocation3], 0  ;;  %s1143_s0 = inlined_call_operand.vmem [shape: f32[16,1], index: 0, kind: input, shape index: {}]   ;;  %s1144_s1 = inlined_call_operand.vmem [shape: f32[1,128], index: 1, kind: input, shape index: {}]   ;;  %s1145_s2 = inlined_call_operand.hbm [shape: f32[256,128], index: 2, kind: input, shape index: {}]   ;;  %s1146_s3 = inlined_call_operand.vmem [shape: f32[1,128], index: 3, kind: input, shape index: {}]   ;;  %s1147_s4 = inlined_call_operand.hbm [shape: f32[16,128], index: 4, kind: output, shape index: {}]  }
   0x1   :  { %10 = vsyncpa [#allocation4], 0  ;;  %s19_s17 = sshll.u32 %s1145_s2, 4  ;;  %s885_s18 = smov [#allocation2]   ;;  %s20_s17 = int_to_ptr.hbm [resolvable:$true] %s19_s17 }
   0x2   :  { %s21_s19 = sshll.u32 %s885_s18, 4  ;;  %s886_s20 = smov 128   ;;  %s22_s19 = int_to_ptr.vmem [resolvable:$true] %s21_s19 }
   0x3   :  { %s887_s21 = smov 8  }
   0x4   :  { %27 = dma.hbm_to_vmem [thread:$0]  %s20_s17, 4096, %s22_s19, [#allocation3], %s886_s20, %s886_s20, %s887_s21  }
   0x5   :  { %881 = dma.done.wait [#allocation3], 4096  }
   0x6   :  { %882 = vsyncadd [#allocation3], 4294963200  ;;  %v888_v0 = vmov 0   ;;  %v37_v1 = vld [vmem:[%s1143_s0 + $0x8] sm:$0xff]  ;;  %v36_v2 = vld [vmem:[%s1143_s0] sm:$0xff]  ;;  %s895_s27 = smov [#allocation5]  }
   0x7   :  { %830 = vset.pattern.permute.xlu0 %v888_v0  ;;  %v831_v3 = vld [vmem:[%s1144_s1] ss:$0 sm:$0xff]  ;;  %v687_v4 = vld [vmem:[#allocation2 + $0x78] sm:$0xff]  ;;  %v686_v6 = vld [vmem:[#allocation2 + $0x70] sm:$0xff]  ;;  %v889_v41 = vmov 2102212464  }
   0x8   :  { %46 = vperm.xlu0 %830, %v37_v1   ;;  %v703_v5 = vld [vmem:[#allocation2 + $0xf8] sm:$0xff]  ;;  %787 = vmatpush.msra.mxu2 %v687_v4  ;;  %v702_v7 = vld [vmem:[#allocation2 + $0xf0] sm:$0xff]  ;;  %v685_v9 = vld [vmem:[#allocation2 + $0x68] sm:$0xff]  ;;  %v890_v44 = vmov 920167782   ;;  %s760_s28 = sshll.u32 %s895_s27, 4  ;;  %s761_s28 = int_to_ptr.vmem [resolvable:$true] %s760_s28 }
   0x9   :  { %803 = vmatpush.msra.mxu3 %v703_v5  ;;  %v701_v10 = vld [vmem:[#allocation2 + $0xe8] sm:$0xff]  ;;  %708 = vmatpush.msra.mxu0 %v687_v4  ;;  %v684_v12 = vld [vmem:[#allocation2 + $0x60] sm:$0xff]  ;;  %v683_v15 = vld [vmem:[#allocation2 + $0x58] sm:$0xff]  ;;  %v891_v49 = vmov 683565275   ;;  %s762_s5 = sshll.u32 %s1147_s4, 4  ;;  %s763_s5 = int_to_ptr.hbm [resolvable:$true] %s762_s5 }
   0xa   :  { %731 = vmatpush.msra.mxu1 %v703_v5  ;;  %788 = vmatpush.msra.mxu2 %v686_v6  ;;  %v700_v13 = vld [vmem:[#allocation2 + $0xe0] sm:$0xff]  ;;  %v699_v16 = vld [vmem:[#allocation2 + $0xd8] sm:$0xff]  ;;  %v682_v19 = vld [vmem:[#allocation2 + $0x50] sm:$0xff]  ;;  %v892_v51 = vmov 2475754826  }
   0xb   :  { %804 = vmatpush.msra.mxu3 %v702_v7  ;;  %709 = vmatpush.msra.mxu0 %v686_v6  ;;  %v698_v20 = vld [vmem:[#allocation2 + $0xd0] sm:$0xff]  ;;  %v681_v23 = vld [vmem:[#allocation2 + $0x48] sm:$0xff]  ;;  %v680_v28 = vld [vmem:[#allocation2 + $0x40] sm:$0xff]  ;;  %v893_v54 = vmov 1326507024  }
   0xc   :  { %732 = vmatpush.msra.mxu1 %v702_v7  ;;  %789 = vmatpush.msra.mxu2 %v685_v9  ;;  %v697_v24 = vld [vmem:[#allocation2 + $0xc8] sm:$0xff]  ;;  %v696_v29 = vld [vmem:[#allocation2 + $0xc0] sm:$0xff]  ;;  %v679_v32 = vld [vmem:[#allocation2 + $0x38] sm:$0xff]  ;;  %v894_v56 = vmov 2131351028  }
   0xd   :  { %805 = vmatpush.msra.mxu3 %v701_v10  ;;  %710 = vmatpush.msra.mxu0 %v685_v9  ;;  %v695_v33 = vld [vmem:[#allocation2 + $0xb8] sm:$0xff]  ;;  %v678_v37 = vld [vmem:[#allocation2 + $0x30] sm:$0xff]  ;;  %v677_v47 = vld [vmem:[#allocation2 + $0x28] sm:$0xff] }
   0xe   :  { %733 = vmatpush.msra.mxu1 %v701_v10  ;;  %790 = vmatpush.msra.mxu2 %v684_v12  ;;  %v694_v38 = vld [vmem:[#allocation2 + $0xb0] sm:$0xff]  ;;  %v693_v48 = vld [vmem:[#allocation2 + $0xa8] sm:$0xff]  ;;  %v676_v60 = vld [vmem:[#allocation2 + $0x20] sm:$0xff] }
   0xf   :  { %806 = vmatpush.msra.mxu3 %v700_v13  ;;  %711 = vmatpush.msra.mxu0 %v684_v12  ;;  %v692_v61 = vld [vmem:[#allocation2 + $0xa0] sm:$0xff]  ;;  %v675_v5 = vld [vmem:[#allocation2 + $0x18] sm:$0xff] }
  0x10   :  { %41 = vperm.xlu0 %830, %v36_v2   ;;  %734 = vmatpush.msra.mxu1 %v700_v13  ;;  %v691_v6 = vld [vmem:[#allocation2 + $0x98] sm:$0xff] }
  0x11   :  { %791 = vmatpush.msra.mxu2 %v683_v15  ;;  %807 = vmatpush.msra.mxu3 %v699_v16 }
  0x12   :  { %712 = vmatpush.msra.mxu0 %v683_v15  ;;  %735 = vmatpush.msra.mxu1 %v699_v16  ;;  %v674_v15 = vld [vmem:[#allocation2 + $0x10] sm:$0xff] }
  0x13   :  { %792 = vmatpush.msra.mxu2 %v682_v19  ;;  %808 = vmatpush.msra.mxu3 %v698_v20  ;;  %v690_v16 = vld [vmem:[#allocation2 + $0x90] sm:$0xff] }
  0x14   :  { %713 = vmatpush.msra.mxu0 %v682_v19  ;;  %736 = vmatpush.msra.mxu1 %v698_v20  ;;  %v673_v20 = vld [vmem:[#allocation2 + $0x8] sm:$0xff] }
  0x15   :  { %793 = vmatpush.msra.mxu2 %v681_v23  ;;  %809 = vmatpush.msra.mxu3 %v697_v24 }
  0x16   :  { %714 = vmatpush.msra.mxu0 %v681_v23  ;;  %737 = vmatpush.msra.mxu1 %v697_v24 }
  0x17   :  { %794 = vmatpush.msra.mxu2 %v680_v28  ;;  %810 = vmatpush.msra.mxu3 %v696_v29 }
  0x18   :  { %715 = vmatpush.msra.mxu0 %v680_v28  ;;  %738 = vmatpush.msra.mxu1 %v696_v29 }
  0x19   :  { %795 = vmatpush.msra.mxu2 %v679_v32  ;;  %811 = vmatpush.msra.mxu3 %v695_v33 }
  0x1a   :  { %716 = vmatpush.msra.mxu0 %v679_v32  ;;  %739 = vmatpush.msra.mxu1 %v695_v33 }
  0x1b   :  { %796 = vmatpush.msra.mxu2 %v678_v37  ;;  %812 = vmatpush.msra.mxu3 %v694_v38 }
  0x1c   :  { %717 = vmatpush.msra.mxu0 %v678_v37  ;;  %740 = vmatpush.msra.mxu1 %v694_v38 }
  0x1d   :  { %797 = vmatpush.msra.mxu2 %v677_v47  ;;  %813 = vmatpush.msra.mxu3 %v693_v48 }
  0x1e   :  { %718 = vmatpush.msra.mxu0 %v677_v47  ;;  %741 = vmatpush.msra.mxu1 %v693_v48 }
  0x1f   :  { %798 = vmatpush.msra.mxu2 %v676_v60  ;;  %814 = vmatpush.msra.mxu3 %v692_v61 }
  0x20   :  { %719 = vmatpush.msra.mxu0 %v676_v60  ;;  %742 = vmatpush.msra.mxu1 %v692_v61 }
  0x21   :  { %799 = vmatpush.msra.mxu2 %v675_v5  ;;  %815 = vmatpush.msra.mxu3 %v691_v6 }
  0x22   :  { %720 = vmatpush.msra.mxu0 %v675_v5  ;;  %743 = vmatpush.msra.mxu1 %v691_v6 }
  0x23   :  { %800 = vmatpush.msra.mxu2 %v674_v15  ;;  %816 = vmatpush.msra.mxu3 %v690_v16 }
  0x24   :  { %721 = vmatpush.msra.mxu0 %v674_v15  ;;  %744 = vmatpush.msra.mxu1 %v690_v16 }
  0x25   :  { %801 = vmatpush.msra.mxu2 %v673_v20 }
  0x26   :  { %722 = vmatpush.msra.mxu0 %v673_v20 }
  0x7a   :  { %v47_v8 = vpop.permute.xlu0 %46 }
  0x7b   :  { %v937_v11 = vmul.f32 %v831_v3, %v47_v8 }
  0x7d   :  { %v211_v14 = vand.u32 2139095040, %v937_v11  ;;  %v208_v18 = vand.u32 2147483647, %v937_v11 }
  0x7f   :  { %v212_v17 = vshrl.u32 %v211_v14, 23  ;;  %v215_v27 = vand.u32 8388607, %v208_v18 }
  0x81   :  { %v778_v21 = vadd.s32 4294967169, %v212_v17  ;;  %v216_v36 = vor.u32 8388608, %v215_v27 }
  0x82   :  { %v42_v22 = vpop.permute.xlu0 %41 }
  0x83   :  { %v218_v25 = vadd.s32 1, %v778_v21  ;;  %v941_v26 = vmul.f32 %v831_v3, %v42_v22  ;;  %v960_v58 = vshll.u32 %v216_v36, 8  ;;  %v688_v36 = vld [vmem:[#allocation2 + $0x80] sm:$0xff] }
  0x85   :  { %vm219_vm0 = vcmp.gt.s32.totalorder %v218_v25, 0  ;;  %v57_v30 = vand.u32 2139095040, %v941_v26  ;;  %v54_v43 = vand.u32 2147483647, %v941_v26  ;;  %v976_v13 = vand.u32 65535, %v960_v58 }
  0x86   :  { %v220_v31 = vsel %vm219_vm0, %v218_v25, 0  ;;  %v258_v17 = vshrl.u32 %v960_v58, 16  ;;  %v689_v25 = vld [vmem:[#allocation2 + $0x88] sm:$0xff] }
  0x87   :  { %v222_v34 = vand.u32 31, %v220_v31  ;;  %v58_v35 = vshrl.u32 %v57_v30, 23  ;;  %v946_v39 = vshrl.u32 %v220_v31, 5  ;;  %v971_v4 = vand.u32 8388607, %v54_v43  ;;  %817 = vmatpush.msra.mxu3 %v689_v25  ;;  %745 = vmatpush.msra.mxu1 %v689_v25 }
  0x89   :  { %v948_v40 = vsub.s32 32, %v222_v34  ;;  %v234_v42 = vshll.u32 %v889_v41, %v222_v34  ;;  %v237_v45 = vshll.u32 %v890_v44, %v222_v34  ;;  %v775_v46 = vadd.s32 4294967169, %v58_v35  ;;  %v672_v35 = vld [vmem:[#allocation2] sm:$0xff]  ;;  %818 = vmatpush.msra.mxu3 %v688_v36  ;;  %746 = vmatpush.msra.mxu1 %v688_v36 }
  0x8a   :  { %v225_v50 = vshll.u32 %v891_v49, %v222_v34  ;;  %v228_v52 = vshll.u32 %v892_v51, %v222_v34  ;;  %v231_v57 = vshll.u32 %v894_v56, %v222_v34  ;;  %vm243_vm1 = vcmp.lt.s32.totalorder %v946_v39, 4  ;;  %802 = vmatpush.msra.mxu2 %v672_v35  ;;  %723 = vmatpush.msra.mxu0 %v672_v35 }
  0x8b   :  { %v235_v53 = vshrl.u32 %v890_v44, %v948_v40  ;;  %v238_v55 = vshrl.u32 %v893_v54, %v948_v40  ;;  %v64_v59 = vadd.s32 1, %v775_v46  ;;  %v226_v62 = vshrl.u32 %v892_v51, %v948_v40 }
  0x8c   :  { %v229_v63 = vshrl.u32 %v894_v56, %v948_v40  ;;  %v232_v1 = vshrl.u32 %v889_v41, %v948_v40  ;;  %vm240_vm3 = vcmp.lt.s32.totalorder %v946_v39, 1  ;;  %vm242_vm4 = vcmp.lt.s32.totalorder %v946_v39, 3 }
  0x8d   :  { %v236_v2 = vor.u32 %v235_v53, %v234_v42  ;;  %v239_v3 = vor.u32 %v238_v55, %v237_v45  ;;  %vm65_vm2 = vcmp.gt.s32.totalorder %v64_v59, 0  ;;  %v227_v7 = vor.u32 %v226_v62, %v225_v50 }
  0x8e   :  { %v230_v8 = vor.u32 %v229_v63, %v228_v52  ;;  %v233_v9 = vor.u32 %v232_v1, %v231_v57  ;;  %v66_v12 = vsel %vm65_vm2, %v64_v59, 0  ;;  %v224_v21 = vshrl.u32 %v891_v49, %v948_v40 }
  0x8f   :  { %v249_v10 = vsel %vm243_vm1, %v236_v2, 920167782  ;;  %v978_v14 = vand.u32 31, %v66_v12  ;;  %v253_v19 = vsel %vm243_vm1, %v239_v3, 1326507024  ;;  %vm241_vm5 = vcmp.lt.s32.totalorder %v946_v39, 2 }
  0x90   :  { %v248_v22 = vsel %vm240_vm3, %v227_v7, %v230_v8  ;;  %v250_v23 = vsel %vm242_vm4, %v233_v9, %v249_v10  ;;  %v245_v27 = vsel %vm243_vm1, %v233_v9, 2102212464  ;;  %v62_v28 = vor.u32 8388608, %v971_v4 }
  0x91   :  { %v992_v24 = vsub.s32 32, %v978_v14  ;;  %v998_v29 = vshrl.u32 %v66_v12, 5  ;;  %v244_v30 = vsel %vm240_vm3, %v224_v21, %v227_v7  ;;  %v251_v31 = vsel %vm241_vm5, %v248_v22, %v250_v23 }
  0x92   :  { %v252_v32 = vsel %vm240_vm3, %v230_v8, %v233_v9  ;;  %v80_v33 = vshll.u32 %v889_v41, %v978_v14  ;;  %v254_v37 = vsel %vm242_vm4, %v236_v2, %v253_v19  ;;  %v281_v38 = vand.u32 65535, %v251_v31 }
  0x93   :  { %v81_v34 = vshrl.u32 %v890_v44, %v992_v24  ;;  %v84_v40 = vshrl.u32 %v893_v54, %v992_v24  ;;  %v246_v42 = vsel %vm242_vm4, %v230_v8, %v245_v27  ;;  %v255_v45 = vsel %vm241_vm5, %v252_v32, %v254_v37 }
  0x94   :  { %v282_v46 = vshrl.u32 %v251_v31, 16  ;;  %v259_v48 = vand.u32 65535, %v255_v45  ;;  %v260_v50 = vshrl.u32 %v255_v45, 16  ;;  %v83_v52 = vshll.u32 %v890_v44, %v978_v14 }
  0x95   :  { %v1018_v47 = vor.u32 %v81_v34, %v80_v33  ;;  %v285_v54 = vmul.u32 %v281_v38, %v258_v17  ;;  %vm89_vm6 = vcmp.lt.s32.totalorder %v998_v29, 4  ;;  %v1026_v55 = vsel %vm241_vm5, %v244_v30, %v246_v42 }
  0x96   :  { %v284_v53 = vmul.u32 %v282_v46, %v976_v13  ;;  %v262_v57 = vmul.u32 %v260_v50, %v976_v13  ;;  %v1029_v59 = vshll.u32 %v62_v28, 8  ;;  %v85_v60 = vor.u32 %v84_v40, %v83_v52 }
  0x97   :  { %v263_v61 = vmul.u32 %v259_v48, %v258_v17  ;;  %v283_v44 = vmul.u32 %v281_v38, %v976_v13  ;;  %v95_v63 = vsel %vm89_vm6, %v1018_v47, 920167782  ;;  %v261_v1 = vmul.u32 %v259_v48, %v976_v13 }
  0x98   :  { %v287_v62 = vshll.u32 %v284_v53, 16  ;;  %v264_v39 = vmul.u32 %v260_v50, %v258_v17  ;;  %v265_v2 = vshll.u32 %v262_v57, 16  ;;  %v286_v4 = vmul.u32 %v282_v46, %v258_v17 }
  0x99   :  { %v267_v3 = vshll.u32 %v263_v61, 16  ;;  %v289_v5 = vshll.u32 %v285_v54, 16  ;;  %v71_v12 = vshll.u32 %v891_v49, %v978_v14  ;;  %v72_v13 = vshrl.u32 %v892_v51, %v992_v24 }
  0x9a   :  { %vm291_vm7 = vc.u32 %v283_v44, %v287_v62  ;;  %vm269_vm8 = vc.u32 %v261_v1, %v265_v2  ;;  %v271_v6 = vadd.s32 %v265_v2, %v261_v1  ;;  %v293_v8 = vadd.s32 %v287_v62, %v283_v44 }
  0x9b   :  { %v292_v7 = vsel %vm291_vm7, 1, %v888_v0  ;;  %v270_v9 = vsel %vm269_vm8, 1, %v888_v0  ;;  %v266_v15 = vshrl.u32 %v262_v57, 16  ;;  %v288_v19 = vshrl.u32 %v284_v53, 16 }
  0x9c   :  { %v294_v10 = vadd.s32 %v292_v7, %v286_v4  ;;  %v272_v16 = vadd.s32 %v270_v9, %v264_v39  ;;  %vm273_vm9 = vc.u32 %v271_v6, %v267_v3  ;;  %vm295_vm10 = vc.u32 %v293_v8, %v289_v5 }
  0x9d   :  { %v274_v17 = vsel %vm273_vm9, 1, %v888_v0  ;;  %v296_v20 = vsel %vm295_vm10, 1, %v888_v0  ;;  %v1044_v21 = vor.u32 %v72_v13, %v71_v12  ;;  %v74_v25 = vshll.u32 %v892_v51, %v978_v14 }
  0x9e   :  { %v276_v22 = vadd.s32 %v274_v17, %v272_v16  ;;  %v298_v23 = vadd.s32 %v296_v20, %v294_v10  ;;  %v75_v27 = vshrl.u32 %v894_v56, %v992_v24  ;;  %v99_v28 = vsel %vm89_vm6, %v85_v60, 1326507024 }
  0x9f   :  { %v268_v30 = vshrl.u32 %v263_v61, 16  ;;  %v77_v31 = vshll.u32 %v894_v56, %v978_v14  ;;  %v78_v32 = vshrl.u32 %v889_v41, %v992_v24  ;;  %v290_v34 = vshrl.u32 %v285_v54, 16 }
  0xa0   :  { %v277_v33 = vadd.s32 %v276_v22, %v266_v15  ;;  %v299_v35 = vadd.s32 %v298_v23, %v288_v19  ;;  %v1056_v36 = vor.u32 %v75_v27, %v74_v25  ;;  %v1058_v37 = vadd.s32 %v293_v8, %v289_v5 }
  0xa1   :  { %v79_v51 = vor.u32 %v78_v32, %v77_v31  ;;  %vm86_vm11 = vcmp.lt.s32.totalorder %v998_v29, 1  ;;  %vm88_vm12 = vcmp.lt.s32.totalorder %v998_v29, 3  ;;  %v301_v45 = vmul.u32 %v960_v58, %v1026_v55 }
  0xa2   :  { %v1062_v38 = vadd.s32 %v277_v33, %v268_v30  ;;  %v300_v40 = vadd.s32 %v299_v35, %v290_v34  ;;  %v94_v41 = vsel %vm86_vm11, %v1044_v21, %v1056_v36  ;;  %v100_v56 = vsel %vm88_vm12, %v1018_v47, %v99_v28 }
  0xa3   :  { %v96_v14 = vsel %vm88_vm12, %v79_v51, %v95_v63  ;;  %v98_v42 = vsel %vm86_vm11, %v1056_v36, %v79_v51  ;;  %vm87_vm14 = vcmp.lt.s32.totalorder %v998_v29, 2  ;;  %v103_v50 = vand.u32 65535, %v1029_v59 }
  0xa4   :  { %vm303_vm13 = vc.u32 %v1062_v38, %v1058_v37  ;;  %v304_v46 = vadd.s32 1, %v300_v40  ;;  %v97_v48 = vsel %vm87_vm14, %v94_v41, %v96_v14  ;;  %v101_v47 = vsel %vm87_vm14, %v98_v42, %v100_v56 }
  0xa5   :  { %v104_v52 = vshrl.u32 %v1029_v59, 16  ;;  %v105_v54 = vand.u32 65535, %v101_v47  ;;  %v106_v57 = vshrl.u32 %v101_v47, 16  ;;  %v127_v58 = vand.u32 65535, %v97_v48 }
  0xa6   :  { %v305_v53 = vsel %vm303_vm13, %v304_v46, %v300_v40  ;;  %v128_v60 = vshrl.u32 %v97_v48, 16  ;;  %v91_v32 = vsel %vm89_vm6, %v79_v51, 2102212464  ;;  %v70_v34 = vshrl.u32 %v891_v49, %v992_v24 }
  0xa7   :  { %v306_v55 = vadd.s32 %v305_v53, %v301_v45  ;;  %v108_v61 = vmul.u32 %v106_v57, %v103_v50  ;;  %v109_v44 = vmul.u32 %v105_v54, %v104_v52  ;;  %v131_v1 = vmul.u32 %v127_v58, %v104_v52 }
  0xa8   :  { %v130_v63 = vmul.u32 %v128_v60, %v103_v50  ;;  %v107_v39 = vmul.u32 %v105_v54, %v103_v50  ;;  %v110_v4 = vmul.u32 %v106_v57, %v104_v52  ;;  %v129_v5 = vmul.u32 %v127_v58, %v103_v50 }
  0xa9   :  { %v307_v62 = vadd.s32 536870912, %v306_v55  ;;  %v111_v2 = vshll.u32 %v108_v61, 16  ;;  %v113_v7 = vshll.u32 %v109_v44, 16  ;;  %v132_v9 = vmul.u32 %v128_v60, %v104_v52 }
  0xaa   :  { %v133_v6 = vshll.u32 %v130_v63, 16  ;;  %v135_v13 = vshll.u32 %v131_v1, 16  ;;  %v112_v22 = vshrl.u32 %v108_v61, 16  ;;  %v114_v35 = vshrl.u32 %v109_v44, 16 }
  0xab   :  { %v1087_v3 = vshrl.u32 %v307_v62, 30  ;;  %vm115_vm15 = vc.u32 %v107_v39, %v111_v2  ;;  %v117_v8 = vadd.s32 %v111_v2, %v107_v39  ;;  %v134_v41 = vshrl.u32 %v130_v63, 16 }
  0xac   :  { %v116_v12 = vsel %vm115_vm15, 1, %v888_v0  ;;  %vm137_vm0 = vc.u32 %v129_v5, %v133_v6  ;;  %v139_v17 = vadd.s32 %v133_v6, %v129_v5  ;;  %v90_v14 = vsel %vm86_vm11, %v70_v34, %v1044_v21 }
  0xad   :  { %v309_v10 = vshll.u32 %v1087_v3, 30  ;;  %v118_v15 = vadd.s32 %v116_v12, %v110_v4  ;;  %vm119_vm1 = vc.u32 %v117_v8, %v113_v7  ;;  %v138_v16 = vsel %vm137_vm0, 1, %v888_v0 }
  0xae   :  { %v120_v20 = vsel %vm119_vm1, 1, %v888_v0  ;;  %v140_v25 = vadd.s32 %v138_v16, %v132_v9  ;;  %vm141_vm2 = vc.u32 %v139_v17, %v135_v13  ;;  %v136_v45 = vshrl.u32 %v131_v1, 16 }
  0xaf   :  { %v310_v19 = vsub.s32 %v306_v55, %v309_v10  ;;  %v122_v23 = vadd.s32 %v120_v20, %v118_v15  ;;  %v142_v30 = vsel %vm141_vm2, 1, %v888_v0  ;;  %v92_v0 = vsel %vm88_vm12, %v1056_v36, %v91_v32 }
  0xb0   :  { %v144_v40 = vadd.s32 %v142_v30, %v140_v25  ;;  %v143_v51 = vadd.s32 %v139_v17, %v135_v13  ;;  %v93_v49 = vsel %vm87_vm14, %v90_v14, %v92_v0  ;;  %v302_v47 = vadd.s32 %v1058_v37, %v1062_v38 }
  0xb1   :  { %vm311_vm3 = vcmp.lt.s32.totalorder %v310_v19, 0  ;;  %v312_v27 = vsub.s32 0, %v310_v19  ;;  %v123_v28 = vadd.s32 %v122_v23, %v112_v22  ;;  %v147_v57 = vmul.u32 %v1029_v59, %v93_v49 }
  0xb2   :  { %v145_v46 = vadd.s32 %v144_v40, %v134_v41  ;;  %vm210_vm6 = vcmp.lt.s32.totalorder %v937_v11, 0  ;;  %vm1115_vm7 = vcmp.le.f32.partialorder %v208_v18, 0.7853982  ;;  %v332_v6 = vsub.s32 4, %v1087_v3 }
  0xb3   :  { %v313_v31 = vsel %vm311_vm3, %v312_v27, %v310_v19  ;;  %v124_v42 = vadd.s32 %v123_v28, %v114_v35  ;;  %vm351_vm0 = vweird.f32 %v937_v11  ;;  %vm56_vm1 = vcmp.lt.s32.totalorder %v941_v26, 0 }
  0xb4   :  { %v314_v33 = vclz %v313_v31  ;;  %v146_v24 = vadd.s32 %v145_v46, %v136_v45  ;;  %v333_v15 = vsel %vm210_vm6, %v332_v6, %v1087_v3  ;;  %vm55_vm2 = vcmp.le.f32.partialorder %v54_v43, 0.7853982 }
  0xb5   :  { %vm149_vm5 = vc.u32 %v124_v42, %v143_v51  ;;  %v148_v25 = vadd.s32 %v143_v51, %v124_v42 }
  0xb6   :  { %v779_v56 = vadd.s32 4294967294, %v314_v33  ;;  %v150_v21 = vadd.s32 1, %v146_v24 }
  0xb8   :  { %vm780_vm4 = vcmp.lt.s32.totalorder %v779_v56, 0  ;;  %v151_v58 = vsel %vm149_vm5, %v150_v21, %v146_v24 }
  0xb9   :  { %v317_v48 = vsel %vm780_vm4, 0, %v779_v56  ;;  %v152_v61 = vadd.s32 %v151_v58, %v147_v57 }
  0xba   :  { %v318_v50 = vsub.s32 32, %v317_v48  ;;  %v322_v52 = vsub.s32 4294967266, %v317_v48  ;;  %v319_v53 = vshll.u32 %v310_v19, %v317_v48  ;;  %v335_v19 = vsel %vm1115_vm7, 0, %v333_v15 }
  0xbb   :  { %v153_v29 = vadd.s32 536870912, %v152_v61  ;;  %v661_v32 = vadd.s32 3, %v335_v19  ;;  %v352_v45 = vand.u32 3, %v335_v19 }
  0xbc   :  { %v320_v54 = vshrl.u32 %v302_v47, %v318_v50  ;;  %v323_v36 = vadd.s32 127, %v322_v52 }
  0xbd   :  { %v1109_v1 = vshrl.u32 %v153_v29, 30  ;;  %v662_v46 = vand.u32 3, %v661_v32  ;;  %vm353_vm10 = vcmp.lt.s32.totalorder %v352_v45, 2  ;;  %vm354_vm11 = vcmp.eq.s32.totalorder %v352_v45, 0 }
  0xbe   :  { %v321_v55 = vor.u32 %v320_v54, %v319_v53  ;;  %v324_v60 = vshll.u32 %v323_v36, 23  ;;  %vm357_vm12 = vcmp.eq.s32.totalorder %v352_v45, 2 }
  0xbf   :  { %v155_v38 = vshll.u32 %v1109_v1, 30  ;;  %vm663_vm13 = vcmp.lt.s32.totalorder %v662_v46, 2  ;;  %vm664_vm14 = vcmp.eq.s32.totalorder %v662_v46, 0  ;;  %vm667_vm15 = vcmp.eq.s32.totalorder %v662_v46, 2 }
  0xc0   :  { %v325_v44 = vor.u32 4788187, %v324_v60  ;;  %v328_v63 = vcvt.s32.f32 %v321_v55 }
  0xc1   :  { %v156_v2 = vsub.s32 %v152_v61, %v155_v38 }
  0xc2   :  { %v326_v62 = vand.u32 2147483647, %v325_v44  ;;  %v178_v44 = vsub.s32 4, %v1109_v1 }
  0xc3   :  { %vm157_vm8 = vcmp.lt.s32.totalorder %v156_v2, 0  ;;  %v158_v5 = vsub.s32 0, %v156_v2 }
  0xc4   :  { %v329_v37 = vmul.f32 %v328_v63, %v326_v62 }
  0xc5   :  { %v159_v9 = vsel %vm157_vm8, %v158_v5, %v156_v2 }
  0xc6   :  { %v330_v39 = vxor.u32 2147483648, %v329_v37  ;;  %v160_v10 = vclz %v159_v9 }
  0xc8   :  { %v331_v4 = vsel %vm210_vm6, %v330_v39, %v329_v37  ;;  %v776_v18 = vadd.s32 4294967294, %v160_v10  ;;  %v179_v37 = vsel %vm56_vm1, %v178_v44, %v1109_v1 }
  0xc9   :  { %v334_v7 = vsel %vm1115_vm7, %v937_v11, %v331_v4 }
  0xca   :  { %v336_v8 = vmul.f32 %v334_v7, %v334_v7  ;;  %vm777_vm9 = vcmp.lt.s32.totalorder %v776_v18, 0 }
  0xcb   :  { %v163_v23 = vsel %vm777_vm9, 0, %v776_v18  ;;  %vm197_vm9 = vweird.f32 %v941_v26 }
  0xcc   :  { %v337_v12 = vmul.f32 -0.001358992, %v336_v8  ;;  %v344_v13 = vmul.f32 -0.00019511016, %v336_v8  ;;  %v164_v27 = vsub.s32 32, %v163_v23  ;;  %v168_v28 = vsub.s32 4294967266, %v163_v23 }
  0xcd   :  { %v165_v33 = vshll.u32 %v156_v2, %v163_v23  ;;  %v181_v2 = vsel %vm55_vm2, 0, %v179_v37 }
  0xce   :  { %v338_v16 = vadd.f32 0.041655596, %v337_v12  ;;  %v345_v17 = vadd.f32 0.008332121, %v344_v13  ;;  %v166_v34 = vshrl.u32 %v148_v25, %v164_v27  ;;  %v169_v35 = vadd.s32 127, %v168_v28 }
  0xcf   :  { %v198_v12 = vand.u32 3, %v181_v2  ;;  %v832_v28 = vld [vmem:[%s1146_s3] ss:$0 sm:$0xff] }
  0xd0   :  { %v339_v20 = vmul.f32 %v338_v16, %v336_v8  ;;  %v346_v22 = vmul.f32 %v345_v17, %v336_v8  ;;  %v167_v41 = vor.u32 %v166_v34, %v165_v33  ;;  %v170_v56 = vshll.u32 %v169_v35, 23 }
  0xd1   :  { %vm199_vm3 = vcmp.lt.s32.totalorder %v198_v12, 2  ;;  %vm200_vm4 = vcmp.eq.s32.totalorder %v198_v12, 0  ;;  %vm203_vm5 = vcmp.eq.s32.totalorder %v198_v12, 2 }
  0xd2   :  { %v340_v30 = vadd.f32 -0.4999988, %v339_v20  ;;  %v347_v31 = vadd.f32 -0.16666654, %v346_v22  ;;  %v171_v48 = vor.u32 4788187, %v170_v56  ;;  %v174_v51 = vcvt.s32.f32 %v167_v41 }
  0xd4   :  { %v341_v3 = vmul.f32 %v340_v30, %v336_v8  ;;  %v348_v40 = vmul.f32 %v347_v31, %v336_v8  ;;  %v172_v42 = vand.u32 2147483647, %v171_v48 }
  0xd6   :  { %v342_v14 = vadd.f32 1.0, %v341_v3  ;;  %v349_v0 = vadd.f32 1.0, %v348_v40  ;;  %v175_v50 = vmul.f32 %v174_v51, %v172_v42 }
  0xd8   :  { %v350_v49 = vmul.f32 %v349_v0, %v334_v7  ;;  %v358_v24 = vxor.u32 2147483648, %v342_v14  ;;  %v176_v58 = vxor.u32 2147483648, %v175_v50  ;;  %v506_v7 = vadd.s32 3, %v181_v2 }
  0xda   :  { %v355_v47 = vxor.u32 2147483648, %v350_v49  ;;  %v359_v21 = vsel %vm357_vm12, %v358_v24, %v350_v49  ;;  %v669_v54 = vsel %vm667_vm15, %v358_v24, %v350_v49  ;;  %v177_v61 = vsel %vm56_vm1, %v176_v58, %v175_v50 }
  0xdb   :  { %v180_v29 = vsel %vm55_vm2, %v941_v26, %v177_v61  ;;  %v507_v13 = vand.u32 3, %v506_v7 }
  0xdc   :  { %v356_v52 = vsel %vm354_vm11, %v342_v14, %v355_v47  ;;  %v666_v53 = vsel %vm664_vm14, %v342_v14, %v355_v47  ;;  %v182_v62 = vmul.f32 %v180_v29, %v180_v29 }
  0xdd   :  { %v360_v36 = vsel %vm353_vm10, %v356_v52, %v359_v21  ;;  %v670_v57 = vsel %vm663_vm13, %v666_v53, %v669_v54  ;;  %vm508_vm6 = vcmp.lt.s32.totalorder %v507_v13, 2  ;;  %vm509_vm7 = vcmp.eq.s32.totalorder %v507_v13, 0 }
  0xde   :  { %v361_v55 = vsel %vm351_vm0, nan, %v360_v36  ;;  %v671_v60 = vsel %vm351_vm0, nan, %v670_v57  ;;  %v183_v63 = vmul.f32 -0.001358992, %v182_v62  ;;  %v190_v11 = vmul.f32 -0.00019511016, %v182_v62 }
  0xdf   :  { %727 = vmatmul.f32.vlgmr.msra.gmra.mxu2 %v361_v55  ;;  %750 = vmatmul.f32.vlgmr.msra.gmra.mxu3 %v671_v60  ;;  %vm512_vm8 = vcmp.eq.s32.totalorder %v507_v13, 2 }
  0xe0   :  { %v184_v38 = vadd.f32 0.041655596, %v183_v63  ;;  %v191_v39 = vadd.f32 0.008332121, %v190_v11 }
  0xe2   :  { %v185_v59 = vmul.f32 %v184_v38, %v182_v62  ;;  %v192_v4 = vmul.f32 %v191_v39, %v182_v62 }
  0xe4   :  { %v186_v5 = vadd.f32 -0.4999988, %v185_v59  ;;  %v193_v6 = vadd.f32 -0.16666654, %v192_v4 }
  0xe6   :  { %v187_v8 = vmul.f32 %v186_v5, %v182_v62  ;;  %v194_v43 = vmul.f32 %v193_v6, %v182_v62 }
  0xe8   :  { %v188_v9 = vadd.f32 1.0, %v187_v8  ;;  %v195_v10 = vadd.f32 1.0, %v194_v43 }
  0xea   :  { %v196_v15 = vmul.f32 %v195_v10, %v180_v29  ;;  %v204_v18 = vxor.u32 2147483648, %v188_v9 }
  0xec   :  { %v201_v16 = vxor.u32 2147483648, %v196_v15  ;;  %v205_v17 = vsel %vm203_vm5, %v204_v18, %v196_v15  ;;  %v514_v20 = vsel %vm512_vm8, %v204_v18, %v196_v15 }
  0xee   :  { %v202_v1 = vsel %vm200_vm4, %v188_v9, %v201_v16  ;;  %v511_v19 = vsel %vm509_vm7, %v188_v9, %v201_v16 }
  0xef   :  { %v206_v22 = vsel %vm199_vm3, %v202_v1, %v205_v17  ;;  %v515_v23 = vsel %vm508_vm6, %v511_v19, %v514_v20 }
  0xf0   :  { %v207_v25 = vsel %vm197_vm9, nan, %v206_v22  ;;  %v516_v27 = vsel %vm197_vm9, nan, %v515_v23 }
  0xf1   :  { %724 = vmatmul.f32.vlgmr.msra.gmra.mxu0 %v207_v25  ;;  %747 = vmatmul.f32.vlgmr.msra.gmra.mxu1 %v516_v27 }
 0x162   :  { %v728_v30 = vpop.f32.mrf.mxu2  ;;  %v751_v32 = vpop.f32.mrf.mxu3 }
 0x163   :  { %v729_v31 = vadd.f32 %v832_v28, %v728_v30 }
 0x165   :  { %v752_v33 = vadd.f32 %v751_v32, %v729_v31 }
 0x167   :  { %755 = vst [vmem:[#allocation5 + $0x8] sm:$0xff] %v752_v33 }
 0x16e   :  { %v725_v34 = vpop.f32.mrf.mxu0  ;;  %v748_v35 = vpop.f32.mrf.mxu1 }
 0x16f   :  { %v726_v26 = vadd.f32 %v832_v28, %v725_v34 }
 0x171   :  { %v749_v3 = vadd.f32 %v748_v35, %v726_v26 }
 0x173   :  { %754 = vst [vmem:[#allocation5] sm:$0xff] %v749_v3 }
 0x174   :  { %768 = dma.vmem_to_hbm [thread:$0]  %s761_s28, 256, %s763_s5, [#allocation4], %s886_s20, %s886_s20, %s887_s21  }
 0x175   :  { %883 = dma.done.wait [#allocation4], 256  }
 0x176   :  { %884 = vsyncadd [#allocation4], 4294967040 }
 0x177   :  { %773 = vsyncpa [#allocation3], 1 }
 0x178   :  { %774 = vsyncpa [#allocation4], 1 }

</bundles_post_ra>
